<compile_context>
chip_gen: v5e
topology: v5e:2x2
jax: 0.10.0
libtpu: 0.0.40
codegen_flags: <defaults>
</compile_context>

<pallas_src>
import functools

import jax
import jax.numpy as jnp
from jax import lax
from jax.experimental import pallas as pl
from jax.experimental.pallas import tpu as pltpu

# "args" of the module (no learnable weights in this criterion)
NUM_RESIDUES = 32          # args.num_residues
ATOM_LOSS_COEFF = 1.0      # args.atom_loss_coeff
DIFFMODE = "x0"            # args.diffmode
LABEL_SMOOTHING = 0.05

MAX_TOKEN_TILE = 4096      # tokens per grid step (multiple of 128)

# Row layout of the consolidated (28, N) lane-layout side array.
_R_AA = 0          # residue-type labels (as f32, exact for C < 2^24)
_R_MAA = 1         # mask_aa
_R_PAD = 2         # padding_mask (1.0 = padding)
_R_MPOS = 3        # mask_pos
_R_CAT = 4         # 4:7   CA target
_R_CAP = 7         # 7:10  CA prediction
_R_ANGT = 10       # 10:16 angle target
_R_ANGO = 16       # 16:22 angle prediction
_R_AMASK = 22      # 22:28 [ang_mask[...,:3] ; bond_angle_mask]  (torch cat order)
_SIDE_ROWS = 28


def _default_num_core_splits():
    # 2 TensorCores per chip only on v7x; v5e / v6e have a single TC, where a
    # second 'parallel' sweep just adds redundant grid steps.
    try:
        kind = jax.devices()[0].device_kind.lower()
    except Exception:  # pragma: no cover - non-TPU / odd backends
        return 1
    return 2 if ("v7" in kind or "7x" in kind) else 1


def _sum_all(x):
    # (r, c) -> (1, 1); two single-axis reductions (robust lowering).
    return jnp.sum(jnp.sum(x, axis=1, keepdims=True), axis=0, keepdims=True)


def _criterion_kernel(
    logits_ref,    # (C, TT)  native dtype, classes on sublanes, tokens on lanes
    side_ref,      # (28, TT) f32, consolidated side arrays (lane layout)
    out_ref,       # (1, 1, 8) f32  per-core partial sums
    acc_ce,        # VMEM (1, TT) f32
    acc_ok,        # VMEM (1, TT) f32
    acc_cnt,       # VMEM (1, TT) f32
    acc_psq,       # VMEM (3, TT) f32
    acc_pcnt,      # VMEM (1, TT) f32
    acc_asq,       # VMEM (6, TT) f32
    acc_acnt,      # VMEM (6, TT) f32
    *,
    n_tokens,
    num_tiles,
    label_smoothing,
):
    c = pl.program_id(0)
    t = pl.program_id(1)
    tiles_per_core = pl.num_programs(1)
    blk = c * tiles_per_core + t          # un-clamped logical tile index
    C = logits_ref.shape[0]
    TT = logits_ref.shape[1]
    row0 = blk * TT

    @pl.when(t == 0)
    def _init():
        acc_ce[...] = jnp.zeros_like(acc_ce)
        acc_ok[...] = jnp.zeros_like(acc_ok)
        acc_cnt[...] = jnp.zeros_like(acc_cnt)
        acc_psq[...] = jnp.zeros_like(acc_psq)
        acc_pcnt[...] = jnp.zeros_like(acc_pcnt)
        acc_asq[...] = jnp.zeros_like(acc_asq)
        acc_acnt[...] = jnp.zeros_like(acc_acnt)

    # Phantom (clamped) tiles of the second core sweep skip all compute;
    # partial last real tiles are handled by the `valid` lane mask below.
    @pl.when(blk < num_tiles)
    def _compute():
        side = side_ref[...]                                     # (28, TT) f32
        lane = lax.broadcasted_iota(jnp.int32, (1, TT), 1)
        valid = (row0 + lane) < n_tokens                         # (1, TT) bool

        # ---------- residue-type CE / accuracy (classes on sublanes) ----------
        logits = logits_ref[...].astype(jnp.float32)             # (C, TT)
        # TODO(synk): on v6e/v7x the max/exp chain could stay bf16 (EUP/VPU bf16)
        # if upstream logits are bf16; kept f32 for exact argmax tie-breaking.
        aa_i = side[_R_AA:_R_AA + 1, :].astype(jnp.int32)        # (1, TT)
        mask_aa = jnp.logical_and(side[_R_MAA:_R_MAA + 1, :] > 0, valid)

        m = jnp.max(logits, axis=0, keepdims=True)               # (1, TT)
        ex = jnp.exp(logits - m)                                 # (C, TT)
        lse = jnp.log(jnp.sum(ex, axis=0, keepdims=True)) + m    # (1, TT)
        sum_logits = jnp.sum(logits, axis=0, keepdims=True)      # (1, TT)

        cls = lax.broadcasted_iota(jnp.int32, (C, 1), 0)         # (C, 1) tiny iota
        logit_y = jnp.sum(jnp.where(cls == aa_i, logits, 0.0),
                          axis=0, keepdims=True)                 # (1, TT)
        eps = label_smoothing
        # CE with label smoothing, without materializing logp = logits - lse:
        #   logp_y = logit_y - lse ; sum_logp = sum_logits - C*lse
        ce = -((1.0 - eps) * (logit_y - lse)
               + (eps / C) * (sum_logits - float(C) * lse))      # (1, TT)
        # first-occurrence argmax emulation (matches torch/jnp argmax tie-break)
        pred = jnp.min(jnp.where(logits == m, cls, C),
                       axis=0, keepdims=True)                    # (1, TT) i32

        acc_ce[...] += jnp.where(mask_aa, ce, 0.0)
        acc_ok[...] += jnp.where(jnp.logical_and(mask_aa, pred == aa_i), 1.0, 0.0)
        acc_cnt[...] += jnp.where(mask_aa, 1.0, 0.0)

        # ---------- CA position / angle MSE sums (lane layout) ----------
        sel_pos = jnp.logical_and(
            jnp.logical_and(valid, side[_R_MPOS:_R_MPOS + 1, :] > 0),
            side[_R_PAD:_R_PAD + 1, :] <= 0)                     # (1, TT)

        d = side[_R_CAT:_R_CAT + 3, :] - side[_R_CAP:_R_CAP + 3, :]   # (3, TT)
        acc_psq[...] += jnp.where(sel_pos, d * d, 0.0)
        acc_pcnt[...] += jnp.where(sel_pos, 1.0, 0.0)

        am = side[_R_AMASK:_R_AMASK + 6, :] > 0                  # (6, TT) bool
        uni = jnp.logical_and(am, sel_pos)                       # (6, TT)
        da = side[_R_ANGT:_R_ANGT + 6, :] - side[_R_ANGO:_R_ANGO + 6, :]
        acc_asq[...] += jnp.where(uni, da * da, 0.0)
        acc_acnt[...] += jnp.where(uni, 1.0, 0.0)

    # ---------- finalize: one full reduction per core sweep ----------
    @pl.when(t == tiles_per_core - 1)
    def _finalize():
        pad0 = jnp.zeros((1, 1), jnp.float32)
        out_ref[...] = jnp.concatenate(
            [_sum_all(acc_ce[...]), _sum_all(acc_ok[...]), _sum_all(acc_cnt[...]),
             _sum_all(acc_psq[...]), _sum_all(acc_pcnt[...]),
             _sum_all(acc_asq[...]), _sum_all(acc_acnt[...]), pad0],
            axis=1).reshape(1, 1, 8)


def protein_mae_dist_criterions(batch_data, output_dict, *,
                                atom_loss_coeff=ATOM_LOSS_COEFF,
                                diffmode=DIFFMODE,
                                label_smoothing=LABEL_SMOOTHING,
                                max_token_tile=MAX_TOKEN_TILE,
                                num_core_splits=None):
    logits = output_dict["x"]
    B, L, C = logits.shape
    N = B * L

    # Dominant tensor: class-on-sublane, token-on-lane; native dtype (cast in kernel).
    logits_cn = logits.reshape(N, C).T                           # (C, N)

    if diffmode == "x0":
        ca_t_src = batch_data["pos"][:, :, 1, :]
        ang_t_src = output_dict["ori_angle"][:, :, :6]
    elif diffmode == "epsilon":
        ca_t_src = output_dict["pos_epsilon"][:, :, 1, :]
        ang_t_src = output_dict["ang_epsilon"][:, :, :6]
    else:
        raise ValueError(f"diffmode {diffmode} not supported")

    def rows(x, k):
        return jnp.asarray(x, jnp.float32).reshape(N, k).T       # (k, N)

    # One consolidated lane-layout side array -> single DMA per grid step.
    side = jnp.concatenate([
        rows(batch_data["x"], 1),                  # 0     aa labels
        rows(output_dict["mask_aa"], 1),           # 1     mask_aa
        rows(output_dict["padding_mask"], 1),      # 2     padding mask
        rows(output_dict["mask_pos"], 1),          # 3     mask_pos
        rows(ca_t_src, 3),                         # 4:7   CA target
        rows(output_dict["pred_pos"], 3),          # 7:10  CA prediction
        rows(ang_t_src, 6),                        # 10:16 angle target
        rows(output_dict["angle_output"], 6),      # 16:22 angle prediction
        rows(batch_data["ang_mask"][:, :, :3], 3), # 22:25 ang_mask[:, :, :3]
        rows(output_dict["bond_angle_mask"], 3),   # 25:28 bond_angle_mask
    ], axis=0)                                                   # (28, N)

    # Token tiling / core split.
    max_tt = max(128, (max_token_tile // 128) * 128)
    TT = N if N <= max_tt else max_tt
    num_tiles = -(-N // TT)
    NC = _default_num_core_splits() if num_core_splits is None else num_core_splits
    NC = max(1, min(NC, num_tiles))
    TPC = -(-num_tiles // NC)
    last_blk = num_tiles - 1

    def blk(ci, ti):  # clamp phantom tiles to the last real tile; kernel skips compute
        return jnp.minimum(ci * TPC + ti, last_blk)

    lane_idx = lambda ci, ti: (0, blk(ci, ti))

    kernel = functools.partial(_criterion_kernel, n_tokens=N,
                               num_tiles=num_tiles,
                               label_smoothing=label_smoothing)

    cost = pl.CostEstimate(
        flops=int(8 * N * C + 80 * N),
        transcendentals=int(N * C + N),
        bytes_accessed=int(N * C * logits_cn.dtype.itemsize
                           + _SIDE_ROWS * N * 4 + NC * 32),
    )

    out = pl.pallas_call(
        kernel,
        out_shape=jax.ShapeDtypeStruct((NC, 1, 8), jnp.float32),
        grid_spec=pltpu.PrefetchScalarGridSpec(
            num_scalar_prefetch=0,
            grid=(NC, TPC),
            in_specs=[
                pl.BlockSpec((C, TT), lane_idx),            # logits (class x token)
                pl.BlockSpec((_SIDE_ROWS, TT), lane_idx),   # consolidated side rows
            ],
            out_specs=pl.BlockSpec((1, 1, 8), lambda ci, ti: (ci, 0, 0)),
            scratch_shapes=[
                pltpu.VMEM((1, TT), jnp.float32),   # ce
                pltpu.VMEM((1, TT), jnp.float32),   # correct
                pltpu.VMEM((1, TT), jnp.float32),   # count
                pltpu.VMEM((3, TT), jnp.float32),   # pos sq
                pltpu.VMEM((1, TT), jnp.float32),   # pos cnt
                pltpu.VMEM((6, TT), jnp.float32),   # ang sq
                pltpu.VMEM((6, TT), jnp.float32),   # ang cnt
            ],
        ),
        compiler_params=pltpu.CompilerParams(
            dimension_semantics=("parallel", "arbitrary")),
        cost_estimate=cost,
    )(logits_cn, side)

    sums = jnp.sum(out.reshape(NC, 8), axis=0)
    ce_sum, correct_sum, aa_cnt = sums[0], sums[1], sums[2]
    pos_sqsum, pos_cnt = sums[3], sums[4]
    ang_sqsum, ang_cnt = sums[5], sums[6]

    type_loss = jnp.where(aa_cnt > 0, ce_sum / jnp.maximum(aa_cnt, 1.0), 0.0) * atom_loss_coeff
    type_acc = jnp.where(aa_cnt > 0, correct_sum / jnp.maximum(aa_cnt, 1.0), 0.0)
    pos_loss = jnp.where(pos_cnt > 0, pos_sqsum / jnp.maximum(pos_cnt * 3.0, 1.0), 0.0)
    angle_loss = jnp.where(ang_cnt > 0, ang_sqsum / jnp.maximum(ang_cnt, 1.0), 0.0)

    loss = type_loss + 5.0 * angle_loss + pos_loss
    return loss, {
        "total_loss": loss,
        "loss_type": type_loss,
        "loss_angle": angle_loss,
        "loss_pos": pos_loss,
        "type_acc": type_acc,
    }


# ----------------------------- pure-JAX reference -----------------------------
def _reference(batch_data, output_dict, atom_loss_coeff=ATOM_LOSS_COEFF,
               diffmode=DIFFMODE, eps=LABEL_SMOOTHING):
    logits = output_dict["x"].astype(jnp.float32)
    B, L, C = logits.shape
    aa = batch_data["x"].astype(jnp.int32)
    mask_aa = output_dict["mask_aa"].reshape(B, L).astype(bool)
    padding = output_dict["padding_mask"].reshape(B, L).astype(bool)
    mask_pos = output_dict["mask_pos"].reshape(B, L).astype(bool)

    logp = jax.nn.log_softmax(logits, axis=-1)
    oh = jax.nn.one_hot(aa, C, dtype=jnp.float32)
    ce = -((1.0 - eps) * jnp.sum(oh * logp, -1) + (eps / C) * jnp.sum(logp, -1))
    maf = mask_aa.astype(jnp.float32)
    type_loss = jnp.sum(ce * maf) / jnp.sum(maf) * atom_loss_coeff
    type_acc = jnp.sum((jnp.argmax(logits, -1) == aa).astype(jnp.float32) * maf) / jnp.sum(maf)

    sel = (~padding) & mask_pos
    ca_t = (batch_data["pos"][:, :, 1, :] if diffmode == "x0"
            else output_dict["pos_epsilon"][:, :, 1, :]).astype(jnp.float32)
    ca_p = output_dict["pred_pos"].astype(jnp.float32)
    pos_loss = jnp.sum(sel[..., None] * (ca_t - ca_p) ** 2) / (jnp.sum(sel) * 3.0)

    am = jnp.concatenate([batch_data["ang_mask"][:, :, :3],
                          output_dict["bond_angle_mask"]], -1).astype(bool)
    uni = am & mask_pos[..., None] & (~padding)[..., None]
    ang_t = (output_dict["ori_angle"][:, :, :6] if diffmode == "x0"
             else output_dict["ang_epsilon"][:, :, :6]).astype(jnp.float32)
    da = (ang_t - output_dict["angle_output"].astype(jnp.float32)) ** 2
    angle_loss = jnp.sum(uni * da) / jnp.sum(uni)

    loss = type_loss + 5.0 * angle_loss + pos_loss
    return loss, type_loss, angle_loss, pos_loss, type_acc


def _make_inputs(key, B, L, C):
    ks = jax.random.split(key, 12)
    lengths = jax.random.randint(ks[0], (B,), max(1, L // 2), L + 1)
    padding_mask = jnp.arange(L)[None, :] >= lengths[:, None]     # (B, L) bool

    ang_mask = (jax.random.uniform(ks[3], (B, L, 3)) > 0.2).astype(jnp.float32)
    ang_mask = ang_mask.at[0, 0, :].set(1.0)
    batch_data = {
        "x": jax.random.randint(ks[1], (B, L), 0, C),
        "pos": jax.random.normal(ks[2], (B, L, 3, 3), jnp.float32),
        "ang_mask": ang_mask,
    }

    mask_aa = (jax.random.uniform(ks[4], (B, L, 1)) > 0.4).astype(jnp.float32)
    mask_aa = mask_aa.at[0, 0, 0].set(1.0)
    mask_pos = (jax.random.uniform(ks[5], (B, L, 1, 1)) > 0.3).astype(jnp.float32)
    mask_pos = mask_pos.at[0, 0, 0, 0].set(1.0)
    bond_angle_mask = (jax.random.uniform(ks[6], (B, L, 3)) > 0.3).astype(jnp.float32)
    bond_angle_mask = bond_angle_mask.at[0, 0, :].set(1.0)

    output_dict = {
        "x": jax.random.normal(ks[7], (B, L, C), jnp.float32),
        "x_pair": jax.random.normal(ks[8], (B, L, L, 4), jnp.float32),  # accessed but unused
        "angle_output": jax.random.normal(ks[9], (B, L, 6), jnp.float32),
        "ang_epsilon": jax.random.normal(ks[10], (B, L, 9), jnp.float32),
        "pos_epsilon": jax.random.normal(ks[11], (B, L, 3, 3), jnp.float32),
        "mask_pos": mask_pos,
        "mask_aa": mask_aa,
        "padding_mask": padding_mask,
        "pred_pos": jax.random.normal(ks[2], (B, L, 3), jnp.float32),
        "ori_angle": jax.random.normal(ks[3], (B, L, 6), jnp.float32),
        "bond_angle_mask": bond_angle_mask,
    }
    return batch_data, output_dict


def _check(batch_data, output_dict, **kw):
    loss, logs = protein_mae_dist_criterions(batch_data, output_dict, **kw)
    jax.block_until_ready(loss)
    ref_loss, ref_type, ref_ang, ref_pos, ref_acc = _reference(batch_data, output_dict)
    assert jnp.allclose(loss, ref_loss, rtol=1e-4, atol=1e-5), (loss, ref_loss)
    assert jnp.allclose(logs["loss_type"], ref_type, rtol=1e-4, atol=1e-5)
    assert jnp.allclose(logs["loss_angle"], ref_ang, rtol=1e-4, atol=1e-5)
    assert jnp.allclose(logs["loss_pos"], ref_pos, rtol=1e-4, atol=1e-5)
    assert jnp.allclose(logs["type_acc"], ref_acc, rtol=1e-4, atol=1e-5)


if __name__ == "__main__":
    key = jax.random.PRNGKey(0)
    k0, k1 = jax.random.split(key)

    # Small case: single tile (TT = N), single core sweep.
    bd, od = _make_inputs(k0, B=2, L=8, C=NUM_RESIDUES)
    _check(bd, od)

    # Larger case: multiple token tiles (odd tile count), partial last tile,
    # and (on v7x) the 2-way core split with one clamped phantom tile.
    bd2, od2 = _make_inputs(k1, B=3, L=171, C=NUM_RESIDUES)
    _check(bd2, od2, max_token_tile=256)

    # Explicit 2-way split (exercises phantom-tile skip on any generation).
    _check(bd2, od2, max_token_tile=256, num_core_splits=2)

    print("KERNEL_OK")
</pallas_src>

<mosaic_0001>
module attributes {stable_mosaic.version = 11 : i64} {
  func.func @_criterion_kernel(%arg0: i32, %arg1: i32, %arg2: memref<32x16xf32, #tpu.memory_space<vmem>>, %arg3: memref<28x16xf32, #tpu.memory_space<vmem>>, %arg4: memref<1x1x8xf32, #tpu.memory_space<vmem>>, %arg5: memref<1x16xf32, #tpu.memory_space<vmem>>, %arg6: memref<1x16xf32, #tpu.memory_space<vmem>>, %arg7: memref<1x16xf32, #tpu.memory_space<vmem>>, %arg8: memref<3x16xf32, #tpu.memory_space<vmem>>, %arg9: memref<1x16xf32, #tpu.memory_space<vmem>>, %arg10: memref<6x16xf32, #tpu.memory_space<vmem>>, %arg11: memref<6x16xf32, #tpu.memory_space<vmem>>) attributes {dimension_semantics = [#tpu.dimension_semantics<parallel>, #tpu.dimension_semantics<arbitrary>], iteration_bounds = array<i64: 1, 1>, scalar_prefetch = 0 : i64, scratch_operands = 7 : i64, tpu.core_type = #tpu.core_type<tc>, window_params = [{transform_indices = @transform_0, window_bounds = array<i64: 32, 16>}, {transform_indices = @transform_1, window_bounds = array<i64: 28, 16>}, {transform_indices = @transform_2, window_bounds = array<i64: 1, 1, 8>}]} {
    %c1_i32 = arith.constant 1 : i32
    %0 = arith.muli %arg0, %c1_i32 : i32
    %1 = arith.addi %0, %arg1 : i32
    %c16_i32 = arith.constant 16 : i32
    %2 = arith.muli %1, %c16_i32 : i32
    %c0_i32 = arith.constant 0 : i32
    %3 = arith.cmpi eq, %arg1, %c0_i32 : i32
    %4 = arith.extui %3 : i1 to i32
    %c0_i32_0 = arith.constant 0 : i32
    %5 = arith.cmpi ne, %4, %c0_i32_0 : i32
    scf.if %5 {
      %cst = arith.constant 0.000000e+00 : f32
      %12 = vector.broadcast %cst : f32 to vector<1x16xf32>
      %c0 = arith.constant 0 : index
      %c0_5 = arith.constant 0 : index
      %13 = vector.load %arg5[%c0, %c0_5] : memref<1x16xf32, #tpu.memory_space<vmem>>, vector<1x16xf32>
      tpu.vector_store %arg5[%c0, %c0_5], %12 {strides = array<i32>} : memref<1x16xf32, #tpu.memory_space<vmem>>, vector<1x16xf32>,
      %cst_6 = arith.constant 0.000000e+00 : f32
      %14 = vector.broadcast %cst_6 : f32 to vector<1x16xf32>
      %c0_7 = arith.constant 0 : index
      %c0_8 = arith.constant 0 : index
      %15 = vector.load %arg6[%c0_7, %c0_8] : memref<1x16xf32, #tpu.memory_space<vmem>>, vector<1x16xf32>
      tpu.vector_store %arg6[%c0_7, %c0_8], %14 {strides = array<i32>} : memref<1x16xf32, #tpu.memory_space<vmem>>, vector<1x16xf32>,
      %cst_9 = arith.constant 0.000000e+00 : f32
      %16 = vector.broadcast %cst_9 : f32 to vector<1x16xf32>
      %c0_10 = arith.constant 0 : index
      %c0_11 = arith.constant 0 : index
      %17 = vector.load %arg7[%c0_10, %c0_11] : memref<1x16xf32, #tpu.memory_space<vmem>>, vector<1x16xf32>
      tpu.vector_store %arg7[%c0_10, %c0_11], %16 {strides = array<i32>} : memref<1x16xf32, #tpu.memory_space<vmem>>, vector<1x16xf32>,
      %cst_12 = arith.constant 0.000000e+00 : f32
      %18 = vector.broadcast %cst_12 : f32 to vector<3x16xf32>
      %c0_13 = arith.constant 0 : index
      %c0_14 = arith.constant 0 : index
      %19 = vector.load %arg8[%c0_13, %c0_14] : memref<3x16xf32, #tpu.memory_space<vmem>>, vector<3x16xf32>
      tpu.vector_store %arg8[%c0_13, %c0_14], %18 {strides = array<i32>} : memref<3x16xf32, #tpu.memory_space<vmem>>, vector<3x16xf32>,
      %cst_15 = arith.constant 0.000000e+00 : f32
      %20 = vector.broadcast %cst_15 : f32 to vector<1x16xf32>
      %c0_16 = arith.constant 0 : index
      %c0_17 = arith.constant 0 : index
      %21 = vector.load %arg9[%c0_16, %c0_17] : memref<1x16xf32, #tpu.memory_space<vmem>>, vector<1x16xf32>
      tpu.vector_store %arg9[%c0_16, %c0_17], %20 {strides = array<i32>} : memref<1x16xf32, #tpu.memory_space<vmem>>, vector<1x16xf32>,
      %cst_18 = arith.constant 0.000000e+00 : f32
      %22 = vector.broadcast %cst_18 : f32 to vector<6x16xf32>
      %c0_19 = arith.constant 0 : index
      %c0_20 = arith.constant 0 : index
      %23 = vector.load %arg10[%c0_19, %c0_20] : memref<6x16xf32, #tpu.memory_space<vmem>>, vector<6x16xf32>
      tpu.vector_store %arg10[%c0_19, %c0_20], %22 {strides = array<i32>} : memref<6x16xf32, #tpu.memory_space<vmem>>, vector<6x16xf32>,
      %cst_21 = arith.constant 0.000000e+00 : f32
      %24 = vector.broadcast %cst_21 : f32 to vector<6x16xf32>
      %c0_22 = arith.constant 0 : index
      %c0_23 = arith.constant 0 : index
      %25 = vector.load %arg11[%c0_22, %c0_23] : memref<6x16xf32, #tpu.memory_space<vmem>>, vector<6x16xf32>
      tpu.vector_store %arg11[%c0_22, %c0_23], %24 {strides = array<i32>} : memref<6x16xf32, #tpu.memory_space<vmem>>, vector<6x16xf32>,
    } else {
    }
    %c1_i32_1 = arith.constant 1 : i32
    %6 = arith.cmpi slt, %1, %c1_i32_1 : i32
    %7 = arith.extui %6 : i1 to i32
    %c0_i32_2 = arith.constant 0 : i32
    %8 = arith.cmpi ne, %7, %c0_i32_2 : i32
    scf.if %8 {
      %c0 = arith.constant 0 : index
      %c0_5 = arith.constant 0 : index
      %12 = vector.load %arg3[%c0, %c0_5] : memref<28x16xf32, #tpu.memory_space<vmem>>, vector<28x16xf32>
      %13 = tpu.iota {dimensions = array<i32: 1>} : vector<1x16xi32>
      %14 = vector.broadcast %2 : i32 to vector<1x16xi32>
      %15 = arith.addi %14, %13 : vector<1x16xi32>
      %c16_i32_6 = arith.constant 16 : i32
      %16 = vector.broadcast %c16_i32_6 : i32 to vector<1x16xi32>
      %17 = arith.cmpi slt, %15, %16 : vector<1x16xi32>
      %c0_7 = arith.constant 0 : index
      %c0_8 = arith.constant 0 : index
      %18 = vector.load %arg2[%c0_7, %c0_8] : memref<32x16xf32, #tpu.memory_space<vmem>>, vector<32x16xf32>
      %19 = vector.extract_strided_slice %12 {offsets = [0, 0], sizes = [1, 16], strides = [1, 1]} : vector<28x16xf32> to vector<1x16xf32>
      %20 = arith.fptosi %19 : vector<1x16xf32> to vector<1x16xi32>
      %21 = vector.extract_strided_slice %12 {offsets = [1, 0], sizes = [1, 16], strides = [1, 1]} : vector<28x16xf32> to vector<1x16xf32>
      %cst = arith.constant 0.000000e+00 : f32
      %22 = vector.broadcast %cst : f32 to vector<1x16xf32>
      %23 = arith.cmpf ogt, %21, %22 : vector<1x16xf32>
      %24 = arith.andi %23, %17 : vector<1x16xi1>
      %cst_9 = arith.constant dense<0xFF800000> : vector<16xf32>
      %25 = vector.multi_reduction <maximumf>, %18, %cst_9 [0] : vector<32x16xf32> to vector<16xf32>
      %26 = vector.shape_cast %25 : vector<16xf32> to vector<1x16xf32>
      %27 = vector.broadcast %26 : vector<1x16xf32> to vector<32x16xf32>
      %28 = arith.subf %18, %27 : vector<32x16xf32>
      %29 = math.exp %28 : vector<32x16xf32>
      %cst_10 = arith.constant dense<0.000000e+00> : vector<16xf32>
      %30 = vector.multi_reduction <add>, %29, %cst_10 [0] : vector<32x16xf32> to vector<16xf32>
      %31 = vector.shape_cast %30 : vector<16xf32> to vector<1x16xf32>
      %32 = math.log %31 : vector<1x16xf32>
      %33 = arith.addf %32, %26 : vector<1x16xf32>
      %cst_11 = arith.constant dense<0.000000e+00> : vector<16xf32>
      %34 = vector.multi_reduction <add>, %18, %cst_11 [0] : vector<32x16xf32> to vector<16xf32>
      %35 = vector.shape_cast %34 : vector<16xf32> to vector<1x16xf32>
      %36 = tpu.iota {dimensions = array<i32: 0>} : vector<32x1xi32>
      %37 = vector.broadcast %36 : vector<32x1xi32> to vector<32x16xi32>
      %38 = vector.broadcast %20 : vector<1x16xi32> to vector<32x16xi32>
      %39 = arith.cmpi eq, %37, %38 : vector<32x16xi32>
      %cst_12 = arith.constant 0.000000e+00 : f32
      %40 = vector.broadcast %cst_12 : f32 to vector<32x16xf32>
      %41 = arith.select %39, %18, %40 : vector<32x16xi1>, vector<32x16xf32>
      %cst_13 = arith.constant dense<0.000000e+00> : vector<16xf32>
      %42 = vector.multi_reduction <add>, %41, %cst_13 [0] : vector<32x16xf32> to vector<16xf32>
      %43 = vector.shape_cast %42 : vector<16xf32> to vector<1x16xf32>
      %44 = arith.subf %43, %33 : vector<1x16xf32>
      %cst_14 = arith.constant 0.949999988 : f32
      %45 = vector.broadcast %cst_14 : f32 to vector<1x16xf32>
      %46 = arith.mulf %45, %44 : vector<1x16xf32>
      %cst_15 = arith.constant 3.200000e+01 : f32
      %47 = vector.broadcast %cst_15 : f32 to vector<1x16xf32>
      %48 = arith.mulf %47, %33 : vector<1x16xf32>
      %49 = arith.subf %35, %48 : vector<1x16xf32>
      %cst_16 = arith.constant 1.562500e-03 : f32
      %50 = vector.broadcast %cst_16 : f32 to vector<1x16xf32>
      %51 = arith.mulf %50, %49 : vector<1x16xf32>
      %52 = arith.addf %46, %51 : vector<1x16xf32>
      %cst_17 = arith.constant 0.000000e+00 : f32
      %53 = vector.broadcast %cst_17 : f32 to vector<1x16xf32>
      %54 = arith.subf %53, %52 : vector<1x16xf32>
      %55 = vector.broadcast %26 : vector<1x16xf32> to vector<32x16xf32>
      %56 = arith.cmpf oeq, %18, %55 : vector<32x16xf32>
      %c32_i32 = arith.constant 32 : i32
      %57 = vector.shape_cast %36 : vector<32x1xi32> to vector<32x1xi32>
      %58 = vector.broadcast %57 : vector<32x1xi32> to vector<32x16xi32>
      %59 = vector.broadcast %c32_i32 : i32 to vector<32x16xi32>
      %60 = arith.select %56, %58, %59 : vector<32x16xi1>, vector<32x16xi32>
      %cst_18 = arith.constant dense<2147483647> : vector<16xi32>
      %61 = vector.multi_reduction <minsi>, %60, %cst_18 [0] : vector<32x16xi32> to vector<16xi32>
      %62 = vector.shape_cast %61 : vector<16xi32> to vector<1x16xi32>
      %c0_19 = arith.constant 0 : index
      %c0_20 = arith.constant 0 : index
      %63 = vector.load %arg5[%c0_19, %c0_20] : memref<1x16xf32, #tpu.memory_space<vmem>>, vector<1x16xf32>
      %cst_21 = arith.constant 0.000000e+00 : f32
      %64 = vector.broadcast %cst_21 : f32 to vector<1x16xf32>
      %65 = arith.select %24, %54, %64 : vector<1x16xi1>, vector<1x16xf32>
      %66 = arith.addf %63, %65 : vector<1x16xf32>
      %c0_22 = arith.constant 0 : index
      %c0_23 = arith.constant 0 : index
      %67 = vector.load %arg5[%c0_22, %c0_23] : memref<1x16xf32, #tpu.memory_space<vmem>>, vector<1x16xf32>
      tpu.vector_store %arg5[%c0_22, %c0_23], %66 {strides = array<i32>} : memref<1x16xf32, #tpu.memory_space<vmem>>, vector<1x16xf32>,
      %c0_24 = arith.constant 0 : index
      %c0_25 = arith.constant 0 : index
      %68 = vector.load %arg6[%c0_24, %c0_25] : memref<1x16xf32, #tpu.memory_space<vmem>>, vector<1x16xf32>
      %69 = arith.cmpi eq, %62, %20 : vector<1x16xi32>
      %70 = arith.andi %24, %69 : vector<1x16xi1>
      %cst_26 = arith.constant 1.000000e+00 : f32
      %cst_27 = arith.constant 0.000000e+00 : f32
      %71 = vector.broadcast %cst_26 : f32 to vector<1x16xf32>
      %72 = vector.broadcast %cst_27 : f32 to vector<1x16xf32>
      %73 = arith.select %70, %71, %72 : vector<1x16xi1>, vector<1x16xf32>
      %74 = arith.addf %68, %73 : vector<1x16xf32>
      %c0_28 = arith.constant 0 : index
      %c0_29 = arith.constant 0 : index
      %75 = vector.load %arg6[%c0_28, %c0_29] : memref<1x16xf32, #tpu.memory_space<vmem>>, vector<1x16xf32>
      tpu.vector_store %arg6[%c0_28, %c0_29], %74 {strides = array<i32>} : memref<1x16xf32, #tpu.memory_space<vmem>>, vector<1x16xf32>,
      %c0_30 = arith.constant 0 : index
      %c0_31 = arith.constant 0 : index
      %76 = vector.load %arg7[%c0_30, %c0_31] : memref<1x16xf32, #tpu.memory_space<vmem>>, vector<1x16xf32>
      %cst_32 = arith.constant 1.000000e+00 : f32
      %cst_33 = arith.constant 0.000000e+00 : f32
      %77 = vector.broadcast %cst_32 : f32 to vector<1x16xf32>
      %78 = vector.broadcast %cst_33 : f32 to vector<1x16xf32>
      %79 = arith.select %24, %77, %78 : vector<1x16xi1>, vector<1x16xf32>
      %80 = arith.addf %76, %79 : vector<1x16xf32>
      %c0_34 = arith.constant 0 : index
      %c0_35 = arith.constant 0 : index
      %81 = vector.load %arg7[%c0_34, %c0_35] : memref<1x16xf32, #tpu.memory_space<vmem>>, vector<1x16xf32>
      tpu.vector_store %arg7[%c0_34, %c0_35], %80 {strides = array<i32>} : memref<1x16xf32, #tpu.memory_space<vmem>>, vector<1x16xf32>,
      %82 = vector.extract_strided_slice %12 {offsets = [3, 0], sizes = [1, 16], strides = [1, 1]} : vector<28x16xf32> to vector<1x16xf32>
      %cst_36 = arith.constant 0.000000e+00 : f32
      %83 = vector.broadcast %cst_36 : f32 to vector<1x16xf32>
      %84 = arith.cmpf ogt, %82, %83 : vector<1x16xf32>
      %85 = arith.andi %17, %84 : vector<1x16xi1>
      %86 = vector.extract_strided_slice %12 {offsets = [2, 0], sizes = [1, 16], strides = [1, 1]} : vector<28x16xf32> to vector<1x16xf32>
      %cst_37 = arith.constant 0.000000e+00 : f32
      %87 = vector.broadcast %cst_37 : f32 to vector<1x16xf32>
      %88 = arith.cmpf ole, %86, %87 : vector<1x16xf32>
      %89 = arith.andi %85, %88 : vector<1x16xi1>
      %90 = vector.extract_strided_slice %12 {offsets = [4, 0], sizes = [3, 16], strides = [1, 1]} : vector<28x16xf32> to vector<3x16xf32>
      %91 = vector.extract_strided_slice %12 {offsets = [7, 0], sizes = [3, 16], strides = [1, 1]} : vector<28x16xf32> to vector<3x16xf32>
      %92 = arith.subf %90, %91 : vector<3x16xf32>
      %c0_38 = arith.constant 0 : index
      %c0_39 = arith.constant 0 : index
      %93 = vector.load %arg8[%c0_38, %c0_39] : memref<3x16xf32, #tpu.memory_space<vmem>>, vector<3x16xf32>
      %94 = arith.mulf %92, %92 : vector<3x16xf32>
      %cst_40 = arith.constant 0.000000e+00 : f32
      %95 = vector.shape_cast %89 : vector<1x16xi1> to vector<1x16xi1>
      %96 = vector.broadcast %95 : vector<1x16xi1> to vector<3x16xi1>
      %97 = vector.broadcast %cst_40 : f32 to vector<3x16xf32>
      %98 = arith.select %96, %94, %97 : vector<3x16xi1>, vector<3x16xf32>
      %99 = arith.addf %93, %98 : vector<3x16xf32>
      %c0_41 = arith.constant 0 : index
      %c0_42 = arith.constant 0 : index
      %100 = vector.load %arg8[%c0_41, %c0_42] : memref<3x16xf32, #tpu.memory_space<vmem>>, vector<3x16xf32>
      tpu.vector_store %arg8[%c0_41, %c0_42], %99 {strides = array<i32>} : memref<3x16xf32, #tpu.memory_space<vmem>>, vector<3x16xf32>,
      %c0_43 = arith.constant 0 : index
      %c0_44 = arith.constant 0 : index
      %101 = vector.load %arg9[%c0_43, %c0_44] : memref<1x16xf32, #tpu.memory_space<vmem>>, vector<1x16xf32>
      %cst_45 = arith.constant 1.000000e+00 : f32
      %cst_46 = arith.constant 0.000000e+00 : f32
      %102 = vector.broadcast %cst_45 : f32 to vector<1x16xf32>
      %103 = vector.broadcast %cst_46 : f32 to vector<1x16xf32>
      %104 = arith.select %89, %102, %103 : vector<1x16xi1>, vector<1x16xf32>
      %105 = arith.addf %101, %104 : vector<1x16xf32>
      %c0_47 = arith.constant 0 : index
      %c0_48 = arith.constant 0 : index
      %106 = vector.load %arg9[%c0_47, %c0_48] : memref<1x16xf32, #tpu.memory_space<vmem>>, vector<1x16xf32>
      tpu.vector_store %arg9[%c0_47, %c0_48], %105 {strides = array<i32>} : memref<1x16xf32, #tpu.memory_space<vmem>>, vector<1x16xf32>,
      %107 = vector.extract_strided_slice %12 {offsets = [22, 0], sizes = [6, 16], strides = [1, 1]} : vector<28x16xf32> to vector<6x16xf32>
      %cst_49 = arith.constant 0.000000e+00 : f32
      %108 = vector.broadcast %cst_49 : f32 to vector<6x16xf32>
      %109 = arith.cmpf ogt, %107, %108 : vector<6x16xf32>
      %110 = vector.broadcast %89 : vector<1x16xi1> to vector<6x16xi1>
      %111 = arith.andi %109, %110 : vector<6x16xi1>
      %112 = vector.extract_strided_slice %12 {offsets = [10, 0], sizes = [6, 16], strides = [1, 1]} : vector<28x16xf32> to vector<6x16xf32>
      %113 = vector.extract_strided_slice %12 {offsets = [16, 0], sizes = [6, 16], strides = [1, 1]} : vector<28x16xf32> to vector<6x16xf32>
      %114 = arith.subf %112, %113 : vector<6x16xf32>
      %c0_50 = arith.constant 0 : index
      %c0_51 = arith.constant 0 : index
      %115 = vector.load %arg10[%c0_50, %c0_51] : memref<6x16xf32, #tpu.memory_space<vmem>>, vector<6x16xf32>
      %116 = arith.mulf %114, %114 : vector<6x16xf32>
      %cst_52 = arith.constant 0.000000e+00 : f32
      %117 = vector.broadcast %cst_52 : f32 to vector<6x16xf32>
      %118 = arith.select %111, %116, %117 : vector<6x16xi1>, vector<6x16xf32>
      %119 = arith.addf %115, %118 : vector<6x16xf32>
      %c0_53 = arith.constant 0 : index
      %c0_54 = arith.constant 0 : index
      %120 = vector.load %arg10[%c0_53, %c0_54] : memref<6x16xf32, #tpu.memory_space<vmem>>, vector<6x16xf32>
      tpu.vector_store %arg10[%c0_53, %c0_54], %119 {strides = array<i32>} : memref<6x16xf32, #tpu.memory_space<vmem>>, vector<6x16xf32>,
      %c0_55 = arith.constant 0 : index
      %c0_56 = arith.constant 0 : index
      %121 = vector.load %arg11[%c0_55, %c0_56] : memref<6x16xf32, #tpu.memory_space<vmem>>, vector<6x16xf32>
      %cst_57 = arith.constant 1.000000e+00 : f32
      %cst_58 = arith.constant 0.000000e+00 : f32
      %122 = vector.broadcast %cst_57 : f32 to vector<6x16xf32>
      %123 = vector.broadcast %cst_58 : f32 to vector<6x16xf32>
      %124 = arith.select %111, %122, %123 : vector<6x16xi1>, vector<6x16xf32>
      %125 = arith.addf %121, %124 : vector<6x16xf32>
      %c0_59 = arith.constant 0 : index
      %c0_60 = arith.constant 0 : index
      %126 = vector.load %arg11[%c0_59, %c0_60] : memref<6x16xf32, #tpu.memory_space<vmem>>, vector<6x16xf32>
      tpu.vector_store %arg11[%c0_59, %c0_60], %125 {strides = array<i32>} : memref<6x16xf32, #tpu.memory_space<vmem>>, vector<6x16xf32>,
    } else {
    }
    %c0_i32_3 = arith.constant 0 : i32
    %9 = arith.cmpi eq, %arg1, %c0_i32_3 : i32
    %10 = arith.extui %9 : i1 to i32
    %c0_i32_4 = arith.constant 0 : i32
    %11 = arith.cmpi ne, %10, %c0_i32_4 : i32
    scf.if %11 {
      %cst = arith.constant 0.000000e+00 : f32
      %12 = vector.broadcast %cst : f32 to vector<1x1xf32>
      %c0 = arith.constant 0 : index
      %c0_5 = arith.constant 0 : index
      %13 = vector.load %arg5[%c0, %c0_5] : memref<1x16xf32, #tpu.memory_space<vmem>>, vector<1x16xf32>
      %cst_6 = arith.constant dense<0.000000e+00> : vector<1xf32>
      %14 = vector.multi_reduction <add>, %13, %cst_6 [1] : vector<1x16xf32> to vector<1xf32>
      %15 = vector.shape_cast %14 : vector<1xf32> to vector<1x1xf32>
      %cst_7 = arith.constant dense<0.000000e+00> : vector<1xf32>
      %16 = vector.multi_reduction <add>, %15, %cst_7 [0] : vector<1x1xf32> to vector<1xf32>
      %17 = vector.shape_cast %16 : vector<1xf32> to vector<1x1xf32>
      %c0_8 = arith.constant 0 : index
      %c0_9 = arith.constant 0 : index
      %18 = vector.load %arg6[%c0_8, %c0_9] : memref<1x16xf32, #tpu.memory_space<vmem>>, vector<1x16xf32>
      %cst_10 = arith.constant dense<0.000000e+00> : vector<1xf32>
      %19 = vector.multi_reduction <add>, %18, %cst_10 [1] : vector<1x16xf32> to vector<1xf32>
      %20 = vector.shape_cast %19 : vector<1xf32> to vector<1x1xf32>
      %cst_11 = arith.constant dense<0.000000e+00> : vector<1xf32>
      %21 = vector.multi_reduction <add>, %20, %cst_11 [0] : vector<1x1xf32> to vector<1xf32>
      %22 = vector.shape_cast %21 : vector<1xf32> to vector<1x1xf32>
      %c0_12 = arith.constant 0 : index
      %c0_13 = arith.constant 0 : index
      %23 = vector.load %arg7[%c0_12, %c0_13] : memref<1x16xf32, #tpu.memory_space<vmem>>, vector<1x16xf32>
      %cst_14 = arith.constant dense<0.000000e+00> : vector<1xf32>
      %24 = vector.multi_reduction <add>, %23, %cst_14 [1] : vector<1x16xf32> to vector<1xf32>
      %25 = vector.shape_cast %24 : vector<1xf32> to vector<1x1xf32>
      %cst_15 = arith.constant dense<0.000000e+00> : vector<1xf32>
      %26 = vector.multi_reduction <add>, %25, %cst_15 [0] : vector<1x1xf32> to vector<1xf32>
      %27 = vector.shape_cast %26 : vector<1xf32> to vector<1x1xf32>
      %c0_16 = arith.constant 0 : index
      %c0_17 = arith.constant 0 : index
      %28 = vector.load %arg8[%c0_16, %c0_17] : memref<3x16xf32, #tpu.memory_space<vmem>>, vector<3x16xf32>
      %cst_18 = arith.constant dense<0.000000e+00> : vector<3xf32>
      %29 = vector.multi_reduction <add>, %28, %cst_18 [1] : vector<3x16xf32> to vector<3xf32>
      %30 = vector.shape_cast %29 : vector<3xf32> to vector<3x1xf32>
      %cst_19 = arith.constant dense<0.000000e+00> : vector<1xf32>
      %31 = vector.multi_reduction <add>, %30, %cst_19 [0] : vector<3x1xf32> to vector<1xf32>
      %32 = vector.shape_cast %31 : vector<1xf32> to vector<1x1xf32>
      %c0_20 = arith.constant 0 : index
      %c0_21 = arith.constant 0 : index
      %33 = vector.load %arg9[%c0_20, %c0_21] : memref<1x16xf32, #tpu.memory_space<vmem>>, vector<1x16xf32>
      %cst_22 = arith.constant dense<0.000000e+00> : vector<1xf32>
      %34 = vector.multi_reduction <add>, %33, %cst_22 [1] : vector<1x16xf32> to vector<1xf32>
      %35 = vector.shape_cast %34 : vector<1xf32> to vector<1x1xf32>
      %cst_23 = arith.constant dense<0.000000e+00> : vector<1xf32>
      %36 = vector.multi_reduction <add>, %35, %cst_23 [0] : vector<1x1xf32> to vector<1xf32>
      %37 = vector.shape_cast %36 : vector<1xf32> to vector<1x1xf32>
      %c0_24 = arith.constant 0 : index
      %c0_25 = arith.constant 0 : index
      %38 = vector.load %arg10[%c0_24, %c0_25] : memref<6x16xf32, #tpu.memory_space<vmem>>, vector<6x16xf32>
      %cst_26 = arith.constant dense<0.000000e+00> : vector<6xf32>
      %39 = vector.multi_reduction <add>, %38, %cst_26 [1] : vector<6x16xf32> to vector<6xf32>
      %40 = vector.shape_cast %39 : vector<6xf32> to vector<6x1xf32>
      %cst_27 = arith.constant dense<0.000000e+00> : vector<1xf32>
      %41 = vector.multi_reduction <add>, %40, %cst_27 [0] : vector<6x1xf32> to vector<1xf32>
      %42 = vector.shape_cast %41 : vector<1xf32> to vector<1x1xf32>
      %c0_28 = arith.constant 0 : index
      %c0_29 = arith.constant 0 : index
      %43 = vector.load %arg11[%c0_28, %c0_29] : memref<6x16xf32, #tpu.memory_space<vmem>>, vector<6x16xf32>
      %cst_30 = arith.constant dense<0.000000e+00> : vector<6xf32>
      %44 = vector.multi_reduction <add>, %43, %cst_30 [1] : vector<6x16xf32> to vector<6xf32>
      %45 = vector.shape_cast %44 : vector<6xf32> to vector<6x1xf32>
      %cst_31 = arith.constant dense<0.000000e+00> : vector<1xf32>
      %46 = vector.multi_reduction <add>, %45, %cst_31 [0] : vector<6x1xf32> to vector<1xf32>
      %47 = vector.shape_cast %46 : vector<1xf32> to vector<1x1xf32>
      %48 = tpu.concatenate %17, %22, %27, %32, %37, %42, %47, %12 in 1 : vector<1x1xf32>, vector<1x1xf32>, vector<1x1xf32>, vector<1x1xf32>, vector<1x1xf32>, vector<1x1xf32>, vector<1x1xf32>, vector<1x1xf32> -> vector<1x8xf32>
      %49 = vector.shape_cast %48 : vector<1x8xf32> to vector<1x1x8xf32>
      %c0_32 = arith.constant 0 : index
      %c0_33 = arith.constant 0 : index
      %c0_34 = arith.constant 0 : index
      %50 = vector.load %arg4[%c0_32, %c0_33, %c0_34] : memref<1x1x8xf32, #tpu.memory_space<vmem>>, vector<1x1x8xf32>
      tpu.vector_store %arg4[%c0_32, %c0_33, %c0_34], %49 {strides = array<i32>} : memref<1x1x8xf32, #tpu.memory_space<vmem>>, vector<1x1x8xf32>,
    } else {
    }
    return
  }
  func.func @transform_0(%arg0: i32, %arg1: i32) -> (i32, i32) {
    %c1_i32 = arith.constant 1 : i32
    %0 = arith.muli %arg0, %c1_i32 : i32
    %1 = arith.addi %0, %arg1 : i32
    %c0_i32 = arith.constant 0 : i32
    %2 = arith.minsi %1, %c0_i32 : i32
    %c0_i32_0 = arith.constant 0 : i32
    %c0_i32_1 = arith.constant 0 : i32
    return %c0_i32_0, %2 : i32, i32
  }
  func.func @transform_1(%arg0: i32, %arg1: i32) -> (i32, i32) {
    %c1_i32 = arith.constant 1 : i32
    %0 = arith.muli %arg0, %c1_i32 : i32
    %1 = arith.addi %0, %arg1 : i32
    %c0_i32 = arith.constant 0 : i32
    %2 = arith.minsi %1, %c0_i32 : i32
    %c0_i32_0 = arith.constant 0 : i32
    %c0_i32_1 = arith.constant 0 : i32
    return %c0_i32_0, %2 : i32, i32
  }
  func.func @transform_2(%arg0: i32, %arg1: i32) -> (i32, i32, i32) {
    %c0_i32 = arith.constant 0 : i32
    %c0_i32_0 = arith.constant 0 : i32
    %c0_i32_1 = arith.constant 0 : i32
    return %arg0, %c0_i32, %c0_i32_0 : i32, i32, i32
  }
}

</mosaic_0001>

<bundles_post_ra>
// kernel: tpu_custom_call.1
= control target key start
LH: loop header
LB: loop body
LE: loop exit
PB: predicated region body
PF: predicated region fallthrough
CT: control target
= control target key end

     0   :  { %vm76_vm0 = vcmask 124928   ;;  %vm102_vm1 = vcmask 130048   ;;  %v470_v1 = vmov 0.0   ;;  %v90_v9 = vlaneseq  ;;  %s654_s0 = inlined_call_operand.vmem [shape: f32[32,16], index: 0, kind: input, shape index: {}]   ;;  %s655_s1 = inlined_call_operand.vmem [shape: f32[28,16], index: 1, kind: input, shape index: {}]   ;;  %s656_s2 = inlined_call_operand.hbm [shape: f32[1,1,8], index: 2, kind: output, shape index: {}]  }
   0x1   :  { %v491_v0 = vld [vmem:[%s655_s1] sm:$0xff]  ;;  %77 = vst.msk [vmem:[#allocation5] sm:$0x7] %vm76_vm0, %v470_v1  ;;  %v96_v3 = vld [vmem:[%s654_s0 + $0x8] sm:$0xff]  ;;  %v506_v6 = vld [vmem:[%s654_s0 + $0x10] sm:$0xff] }
   0x2   :  { %v95_v2 = vld [vmem:[%s654_s0] sm:$0xff]  ;;  %v427_v4 = vceil.f32 %v491_v0  ;;  %v428_v5 = vfloor.f32 %v491_v0  ;;  %v511_v7 = vld [vmem:[%s654_s0 + $0x18] sm:$0xff]  ;;  %vm426_vm2 = vcmp.lt.s32.totalorder %v491_v0, 0  ;;  %v104_v10 = vsel %vm102_vm1, %v96_v3, -inf }
   0x3   :  { %v103_v8 = vsel %vm102_vm1, %v95_v2, -inf  ;;  %v105_v11 = vsel %vm102_vm1, %v506_v6, -inf  ;;  %v106_v12 = vsel %vm102_vm1, %v511_v7, -inf }
   0x4   :  { %7 = vsyncpa [#allocation10], 0  ;;  %v520_v13 = vsel %vm426_vm2, %v427_v4, %v428_v5  ;;  %v107_v14 = vmax.f32 %v103_v8, %v104_v10  ;;  %v108_v15 = vmax.f32 %v105_v11, %v106_v12  ;;  %v158_v18 = vshrl.u32 %v90_v9, 7  ;;  %s405_s27 = sshll.u32 %s656_s2, 4  ;;  %s406_s27 = int_to_ptr.hbm [resolvable:$true] %s405_s27 }
   0x5   :  { %v430_v17 = vcvt.f32.s32 %v520_v13  ;;  %v91_v35 = vand.u32 127, %v90_v9  ;;  %v144_v36 = vsel %vm102_vm1, %v95_v2, 0.0  ;;  %v145_v44 = vsel %vm102_vm1, %v96_v3, 0.0 }
   0x6   :  { %v109_v16 = vmax.f32 %v107_v14, %v108_v15  ;;  %v159_v21 = vadd.s32 8, %v158_v18  ;;  %v160_v25 = vadd.s32 16, %v158_v18  ;;  %v161_v30 = vadd.s32 24, %v158_v18  ;;  %v87_v14 = vld [vmem:[%s655_s1 + $0x8] sm:$0xff] }
   0x7   :  { %v162_v22 = vperm.slane %v430_v17, 0  ;;  %v146_v53 = vadd.f32 %v145_v44, %v144_v36  ;;  %v147_v57 = vsel %vm102_vm1, %v506_v6, 0.0  ;;  %vm100_vm13 = vcmp.gt.f32.partialorder %v491_v0, 0.0 }
   0x8   :  { %v110_v19 = vrot.slane %v109_v16, 4  ;;  %vm94_vm15 = vcmp.lt.s32.totalorder %v91_v35, 16  ;;  %v149_v11 = vsel %vm102_vm1, %v511_v7, 0.0  ;;  %vm251_vm2 = vcmp.le.f32.partialorder %v491_v0, 0.0 }
   0x9   :  { %vm163_vm3 = vcmp.eq.s32.totalorder %v158_v18, %v162_v22  ;;  %vm164_vm4 = vcmp.eq.s32.totalorder %v159_v21, %v162_v22  ;;  %vm165_vm5 = vcmp.eq.s32.totalorder %v160_v25, %v162_v22  ;;  %vm166_vm6 = vcmp.eq.s32.totalorder %v161_v30, %v162_v22 }
   0xa   :  { %v111_v20 = vmax.f32 %v109_v16, %v110_v19  ;;  %v167_v28 = vsel %vm163_vm3, %v95_v2, 0.0  ;;  %v168_v29 = vsel %vm164_vm4, %v96_v3, 0.0  ;;  %v169_v43 = vsel %vm165_vm5, %v506_v6, 0.0  ;;  %vm569_vm3 = vmand %vm100_vm13, %vm94_vm15 }
   0xb   :  { %v171_v37 = vsel %vm102_vm1, %v167_v28, 0.0  ;;  %v172_v38 = vsel %vm102_vm1, %v168_v29, 0.0  ;;  %v170_v50 = vsel %vm166_vm6, %v511_v7, 0.0  ;;  %v174_v51 = vsel %vm102_vm1, %v169_v43, 0.0 }
   0xc   :  { %v112_v23 = vrot.slane %v111_v20, 2  ;;  %v173_v45 = vadd.f32 %v172_v38, %v171_v37  ;;  %v148_v5 = vadd.f32 %v147_v57, %v146_v53  ;;  %v471_v19 = vmov 0  }
   0xd   :  { %vm258_vm5 = vcmask 1044480   ;;  %vm302_vm15 = vcmask 1041408  }
   0xe   :  { %v113_v24 = vmax.f32 %v111_v20, %v112_v23  ;;  %v175_v59 = vadd.f32 %v174_v51, %v173_v45  ;;  %v252_v20 = vsel %vm251_vm2, 1, %v471_v19 }
   0xf   :  { %v253_v22 = vrot.slane %v252_v20, 7 }
  0x10   :  { %v114_v26 = vrot.slane %v113_v24, 1 }
  0x12   :  { %v525_v27 = vmax.f32 %v113_v24, %v114_v26  ;;  %v259_v24 = vrot.slane %v491_v0, 3 }
  0x14   :  { %v116_v31 = vsub.f32 %v95_v2, %v525_v27  ;;  %v117_v32 = vsub.f32 %v96_v3, %v525_v27  ;;  %v118_v33 = vsub.f32 %v506_v6, %v525_v27  ;;  %v119_v34 = vsub.f32 %v511_v7, %v525_v27 }
  0x15   :  { %vm191_vm7 = vcmp.eq.f32.partialorder %v95_v2, %v525_v27  ;;  %vm192_vm8 = vcmp.eq.f32.partialorder %v96_v3, %v525_v27  ;;  %vm193_vm9 = vcmp.eq.f32.partialorder %v506_v6, %v525_v27  ;;  %vm194_vm10 = vcmp.eq.f32.partialorder %v511_v7, %v525_v27 }
  0x16   :  { %v120_v39 = vmul.f32 1.442695, %v116_v31  ;;  %v122_v40 = vmul.f32 1.442695, %v117_v32  ;;  %v124_v41 = vmul.f32 1.442695, %v118_v33  ;;  %v150_v7 = vadd.f32 %v149_v11, %v148_v5 }
  0x17   :  { %v126_v42 = vmul.f32 1.442695, %v119_v34  ;;  %v195_v46 = vsel %vm191_vm7, %v158_v18, 32  ;;  %v196_v47 = vsel %vm192_vm8, %v159_v21, 32  ;;  %v197_v48 = vsel %vm193_vm9, %v160_v25, 32  ;;  %v88_v32 = vld [vmem:[%s655_s1 + $0x10] sm:$0xff] }
  0x18   :  { %434 = vpow2.f32 %v120_v39  ;;  %v198_v49 = vsel %vm194_vm10, %v161_v30, 32  ;;  %v199_v52 = vsel %vm102_vm1, %v195_v46, 2147483647  ;;  %v200_v54 = vsel %vm102_vm1, %v196_v47, 2147483647 }
  0x19   :  { %436 = vpow2.f32 %v122_v40  ;;  %v201_v55 = vsel %vm102_vm1, %v197_v48, 2147483647  ;;  %v202_v56 = vsel %vm102_vm1, %v198_v49, 2147483647  ;;  %vm203_vm11 = vcmp.lt.s32.totalorder %v199_v52, %v200_v54  ;;  %v89_v48 = vld [vmem:[%s655_s1 + $0x18] sm:$0xf] }
  0x1a   :  { %438 = vpow2.f32 %v124_v41  ;;  %vm205_vm12 = vcmp.lt.s32.totalorder %v201_v55, %v202_v56  ;;  %v204_v60 = vsel %vm203_vm11, %v199_v52, %v200_v54  ;;  %v176_v2 = vsel %vm102_vm1, %v170_v50, 0.0  ;;  %v264_v50 = vld [vmem:[#allocation5] sm:$0x7]  ;;  %s472_s1 = smov [#allocation9]  }
  0x1b   :  { %440 = vpow2.f32 %v126_v42  ;;  %v206_v61 = vsel %vm205_vm12, %v201_v55, %v202_v56  ;;  %v177_v16 = vadd.f32 %v176_v2, %v175_v59  ;;  %v260_v25 = vrot.slane %v87_v14, 3  ;;  %s403_s24 = sshll.u32 %s472_s1, 4  ;;  %s404_s24 = int_to_ptr.vmem [resolvable:$true] %s403_s24 }
  0x1c   :  { %vm207_vm14 = vcmp.lt.s32.totalorder %v204_v60, %v206_v61  ;;  %v151_v33 = vrot.slane %v150_v7, 4  ;;  %v290_v43 = vrot.slane %v88_v32, 6  ;;  %vm79_vm9 = vcmask 128000  }
  0x1d   :  { %v208_v6 = vsel %vm207_vm14, %v204_v60, %v206_v61  ;;  %v178_v26 = vrot.slane %v177_v16, 4  ;;  %v261_v31 = vsel %vm258_vm5, %v259_v24, %v260_v25  ;;  %81 = vst.msk [vmem:[#allocation8] sm:$0x3f] %vm79_vm9, %v470_v1  ;;  %vm72_vm10 = vcmask 122880  }
  0x1e   :  { %v435_v58 = vpop.eup %434  ;;  %v209_v12 = vrot.slane %v208_v6, 4  ;;  %v263_v34 = vsub.f32 %v491_v0, %v261_v31  ;;  %v152_v44 = vadd.f32 %v151_v33, %v150_v7  ;;  %v292_v47 = vsub.f32 %v87_v14, %v290_v43  ;;  %80 = vst.msk [vmem:[#allocation7] sm:$0x3f] %vm79_vm9, %v470_v1 }
  0x1f   :  { %v437_v62 = vpop.eup %436  ;;  %v128_v63 = vsel %vm102_vm1, %v435_v58, 0.0  ;;  %v179_v38 = vadd.f32 %v178_v26, %v177_v16  ;;  %vm285_vm11 = vcmp.gt.f32.partialorder %v88_v32, 0.0  ;;  %vm286_vm12 = vcmp.gt.f32.partialorder %v89_v48, 0.0  ;;  %73 = vst.msk [vmem:[#allocation2] sm:$0x1] %vm72_vm10, %v470_v1 }
  0x20   :  { %v439_v3 = vpop.eup %438  ;;  %v129_v4 = vsel %vm102_vm1, %v437_v62, 0.0  ;;  %vm210_vm4 = vcmp.lt.s32.totalorder %v208_v6, %v209_v12  ;;  %v265_v40 = vmul.f32 %v263_v34, %v263_v34  ;;  %v294_v53 = vmul.f32 %v292_v47, %v292_v47  ;;  %74 = vst.msk [vmem:[#allocation3] sm:$0x1] %vm72_vm10, %v470_v1 }
  0x21   :  { %v441_v8 = vpop.eup %440  ;;  %v130_v9 = vadd.f32 %v129_v4, %v128_v63  ;;  %v131_v10 = vsel %vm102_vm1, %v439_v3, 0.0  ;;  %v211_v30 = vsel %vm210_vm4, %v208_v6, %v209_v12  ;;  %v180_v49 = vrot.slane %v179_v38, 2  ;;  %75 = vst.msk [vmem:[#allocation4] sm:$0x1] %vm72_vm10, %v470_v1 }
  0x22   :  { %v133_v15 = vsel %vm102_vm1, %v441_v8, 0.0  ;;  %vm574_vm1 = vcmp.ne.s32.totalorder %v253_v22, 0  ;;  %v212_v39 = vrot.slane %v211_v30, 2  ;;  %v153_v54 = vrot.slane %v152_v44, 2  ;;  %78 = vst.msk [vmem:[#allocation6] sm:$0x1] %vm72_vm10, %v470_v1 }
  0x23   :  { %v132_v18 = vadd.f32 %v131_v10, %v130_v9  ;;  %vm255_vm6 = vmand %vm569_vm3, %vm574_vm1  ;;  %v181_v57 = vadd.f32 %v180_v49, %v179_v38  ;;  %v296_v58 = vrot.slane %v294_v53, 4  ;;  %v243_v43 = vsel %vm569_vm3, 1.0, %v470_v1 }
  0x24   :  { %v266_v35 = vsel %vm255_vm6, 1, %v471_v19  ;;  %vm213_vm8 = vcmp.lt.s32.totalorder %v211_v30, %v212_v39  ;;  %v154_v59 = vadd.f32 %v153_v54, %v152_v44  ;;  %v310_v9 = vld [vmem:[#allocation8] sm:$0x3f]  ;;  %v277_v48 = vsel %vm255_vm6, 1.0, %v470_v1 }
  0x25   :  { %v134_v23 = vadd.f32 %v133_v15, %v132_v18  ;;  %v267_v37 = vperm.slane %v266_v35, 3  ;;  %v214_v56 = vsel %vm213_vm8, %v211_v30, %v212_v39  ;;  %v182_v4 = vrot.slane %v181_v57, 1  ;;  %v293_v10 = vld [vmem:[#allocation7] sm:$0x3f] }
  0x26   :  { %v215_v60 = vrot.slane %v214_v56, 1  ;;  %v155_v11 = vrot.slane %v154_v59, 1  ;;  %vm363_vm1 = vcmask 1045504   ;;  %vm382_vm6 = vcmask 7168  }
  0x27   :  { %v135_v29 = vrot.slane %v134_v23, 4  ;;  %vm592_vm7 = vcmp.eq.s32.totalorder %v267_v37, 1  ;;  %v228_v44 = vld [vmem:[#allocation3] sm:$0x1]  ;;  %vm386_vm8 = vcmask 23552  }
  0x28   :  { %v269_v0 = vsel %vm592_vm7, %v265_v40, 0.0  ;;  %vm287_vm13 = vmand %vm285_vm11, %vm592_vm7  ;;  %vm216_vm2 = vcmp.lt.s32.totalorder %v214_v56, %v215_v60  ;;  %v156_v26 = vadd.f32 %v155_v11, %v154_v59  ;;  %v242_v49 = vld [vmem:[#allocation4] sm:$0x1]  ;;  %vm392_vm11 = vcmask 48128  }
  0x29   :  { %v136_v36 = vadd.f32 %v135_v29, %v134_v23  ;;  %v271_v46 = vrot.slane %v269_v0, 4  ;;  %vm288_vm14 = vmand %vm286_vm12, %vm592_vm7  ;;  %v298_v61 = vsel %vm287_vm13, %v296_v58, 0.0  ;;  %v311_v62 = vsel %vm287_vm13, 1.0, %v470_v1  ;;  %v276_v54 = vld [vmem:[#allocation6] sm:$0x1] }
  0x2a   :  { %v299_v63 = vsel %vm288_vm14, %v296_v58, 0.0  ;;  %v303_v2 = vrot.slane %v298_v61, 6  ;;  %v312_v3 = vsel %vm288_vm14, 1.0, %v470_v1  ;;  %v315_v6 = vrot.slane %v311_v62, 6 }
  0x2b   :  { %v137_v41 = vrot.slane %v136_v36, 2  ;;  %v273_v52 = vadd.f32 %v271_v46, %v264_v50  ;;  %v304_v5 = vrot.slane %v299_v63, 6  ;;  %v316_v8 = vrot.slane %v312_v3, 6 }
  0x2c   :  { %v183_v23 = vadd.f32 %v182_v4, %v181_v57  ;;  %v217_v24 = vsel %vm216_vm2, %v214_v56, %v215_v60  ;;  %vm384_vm7 = vcmask 15360   ;;  %vm394_vm12 = vcmask 56320  }
  0x2d   :  { %v138_v45 = vadd.f32 %v137_v41, %v136_v36  ;;  %275 = vst.msk [vmem:[#allocation5] sm:$0x7] %vm76_vm0, %v273_v52  ;;  %v305_v12 = vsel %vm302_vm15, %v303_v2, %v304_v5  ;;  %v317_v14 = vsel %vm302_vm15, %v315_v6, %v316_v8  ;;  %vm229_vm4 = vcmp.eq.s32.totalorder %v217_v24, %v430_v17 }
  0x2e   :  { %v319_v20 = vadd.f32 %v317_v14, %v310_v9  ;;  %v307_v7 = vadd.f32 %v305_v12, %v293_v10  ;;  %v230_v33 = vsel %vm229_vm4, 1, %v471_v19  ;;  %v218_v19 = vld [vmem:[#allocation2] sm:$0x1]  ;;  %vm396_vm13 = vcmask 57344  }
  0x2f   :  { %v139_v51 = vrot.slane %v138_v45, 1  ;;  %v231_v39 = vrot.slane %v230_v33, 7 }
  0x30   :  { %320 = vst.msk [vmem:[#allocation8] sm:$0x3f] %vm79_vm9, %v319_v20 }
  0x31   :  { %v140_v55 = vadd.f32 %v139_v51, %v138_v45  ;;  %309 = vst.msk [vmem:[#allocation7] sm:$0x3f] %vm79_vm9, %v307_v7 }
  0x33   :  { %442 = vlog2.f32 %v140_v55 }
  0x34   :  { %v340_v15 = vld [vmem:[#allocation5] sm:$0x7] }
  0x35   :  { %v342_v18 = vsel %vm76_vm0, %v340_v15, 0.0  ;;  %vm232_vm0 = vcmp.ne.s32.totalorder %v231_v39, 0 }
  0x36   :  { %343 = vadd.xlane.f32.xlu0 %v342_v18  ;;  %vm233_vm5 = vmand %vm569_vm3, %vm232_vm0 }
  0x37   :  { %v371_v35 = vld [vmem:[#allocation8] sm:$0x3f]  ;;  %v234_v17 = vsel %vm233_vm5, 1.0, %v470_v1 }
  0x38   :  { %v372_v36 = vsel %vm79_vm9, %v371_v35, 0.0  ;;  %v358_v37 = vld [vmem:[#allocation7] sm:$0x3f] }
  0x39   :  { %v443_v16 = vpop.eup %442  ;;  %373 = vadd.xlane.f32.xlu1 %v372_v36 }
  0x3a   :  { %v142_v22 = vmul.f32 0.6931472, %v443_v16 }
  0x3c   :  { %v143_v25 = vadd.f32 %v142_v22, %v525_v27  ;;  %v360_v27 = vsel %vm79_vm9, %v358_v37, 0.0  ;;  %vm388_vm9 = vcmask 31744  }
  0x3e   :  { %v184_v29 = vsub.f32 %v183_v23, %v143_v25  ;;  %v186_v30 = vmul.f32 32.0, %v143_v25  ;;  %361 = vadd.xlane.f32.xlu0 %v360_v27 }
  0x40   :  { %v185_v31 = vmul.f32 0.95, %v184_v29  ;;  %v187_v32 = vsub.f32 %v156_v26, %v186_v30 }
  0x42   :  { %v188_v34 = vmul.f32 0.0015625, %v187_v32 }
  0x44   :  { %v189_v38 = vadd.f32 %v188_v34, %v185_v31 }
  0x46   :  { %v190_v40 = vsub.f32 0.0, %v189_v38 }
  0x48   :  { %v219_v13 = vsel %vm569_vm3, %v190_v40, 0.0  ;;  %vm345_vm3 = vcmask 1042432  }
  0x49   :  { %221 = vst [vmem:[#allocation1] sm:$0xff] %v219_v13 }
  0x50   :  { %v223_v41 = vld [vmem:[#allocation1 + $0x1] ss:$9 sm:$0xff] }
  0x51   :  { %236 = vst [vmem:[#allocation1] sm:$0xff] %v234_v17  ;;  %v225_v42 = vadd.f32 %v223_v41, %v218_v19 }
  0x53   :  { %227 = vst.msk [vmem:[#allocation2] sm:$0x1] %vm72_vm10, %v225_v42 }
  0x58   :  { %v238_v0 = vld [vmem:[#allocation1 + $0x1] ss:$9 sm:$0xff] }
  0x59   :  { %245 = vst [vmem:[#allocation1] sm:$0xff] %v243_v43  ;;  %v240_v45 = vadd.f32 %v238_v0, %v228_v44 }
  0x5a   :  { %v324_v46 = vld [vmem:[#allocation2] sm:$0x1] }
  0x5b   :  { %241 = vst.msk [vmem:[#allocation3] sm:$0x1] %vm72_vm10, %v240_v45  ;;  %v326_v47 = vsel %vm72_vm10, %v324_v46, 0.0 }
  0x5c   :  { %327 = vadd.xlane.f32.xlu1 %v326_v47 }
  0x60   :  { %v247_v50 = vld [vmem:[#allocation1 + $0x1] ss:$9 sm:$0xff] }
  0x61   :  { %279 = vst [vmem:[#allocation1] sm:$0xff] %v277_v48  ;;  %v249_v51 = vadd.f32 %v247_v50, %v242_v49 }
  0x62   :  { %v330_v52 = vld [vmem:[#allocation3] sm:$0x1] }
  0x63   :  { %250 = vst.msk [vmem:[#allocation4] sm:$0x1] %vm72_vm10, %v249_v51  ;;  %v331_v53 = vsel %vm72_vm10, %v330_v52, 0.0 }
  0x64   :  { %332 = vadd.xlane.f32.xlu2 %v331_v53 }
  0x68   :  { %v281_v55 = vld [vmem:[#allocation1 + $0x3] ss:$9 sm:$0xff] }
  0x69   :  { %v283_v56 = vadd.f32 %v281_v55, %v276_v54 }
  0x6a   :  { %v335_v57 = vld [vmem:[#allocation4] sm:$0x1] }
  0x6b   :  { %v336_v21 = vsel %vm72_vm10, %v335_v57, 0.0  ;;  %284 = vst.msk [vmem:[#allocation6] sm:$0x1] %vm72_vm10, %v283_v56 }
  0x6c   :  { %337 = vadd.xlane.f32.xlu2 %v336_v21 }
  0x72   :  { %v353_v1 = vld [vmem:[#allocation6] sm:$0x1] }
  0x73   :  { %v354_v28 = vsel %vm72_vm10, %v353_v1, 0.0  ;;  %vm390_vm10 = vcmask 39936  }
  0x74   :  { %355 = vadd.xlane.f32.xlu0 %v354_v28 }
  0xa9   :  { %v344_v58 = vpop.xlane.xlu0 %343 }
  0xaa   :  { %v346_v60 = vsel %vm345_vm3, %v344_v58, 0.0 }
  0xab   :  { %v347_v63 = vrot.slane %v346_v60, 4 }
  0xac   :  { %v374_v61 = vpop.xlane.xlu1 %373 }
  0xad   :  { %v375_v2 = vsel %vm363_vm1, %v374_v61, 0.0  ;;  %v348_v5 = vadd.f32 %v347_v63, %v346_v60 }
  0xae   :  { %v376_v4 = vrot.slane %v375_v2, 4 }
  0xaf   :  { %v349_v10 = vrot.slane %v348_v5, 2 }
  0xb0   :  { %v377_v9 = vadd.f32 %v376_v4, %v375_v2 }
  0xb1   :  { %v362_v59 = vpop.xlane.xlu0 %361  ;;  %v350_v14 = vadd.f32 %v349_v10, %v348_v5 }
  0xb2   :  { %v364_v62 = vsel %vm363_vm1, %v362_v59, 0.0  ;;  %v378_v12 = vrot.slane %v377_v9, 2 }
  0xb3   :  { %v365_v3 = vrot.slane %v364_v62, 4  ;;  %v351_v20 = vrot.slane %v350_v14, 1 }
  0xb4   :  { %v379_v18 = vadd.f32 %v378_v12, %v377_v9 }
  0xb5   :  { %v366_v6 = vadd.f32 %v365_v3, %v364_v62  ;;  %v352_v26 = vadd.f32 %v351_v20, %v350_v14 }
  0xb6   :  { %v380_v24 = vrot.slane %v379_v18, 1 }
  0xb7   :  { %v367_v11 = vrot.slane %v366_v6, 2 }
  0xb8   :  { %v381_v32 = vadd.f32 %v380_v24, %v379_v18 }
  0xb9   :  { %v368_v16 = vadd.f32 %v367_v11, %v366_v6 }
  0xbb   :  { %v369_v23 = vrot.slane %v368_v16, 1 }
  0xbd   :  { %v370_v29 = vadd.f32 %v369_v23, %v368_v16 }
  0xcf   :  { %v328_v15 = vpop.xlane.xlu1 %327 }
  0xd7   :  { %v333_v8 = vpop.xlane.xlu2 %332 }
  0xd8   :  { %v383_v7 = vsel %vm382_vm6, %v328_v15, %v333_v8 }
  0xdf   :  { %v338_v22 = vpop.xlane.xlu2 %337 }
  0xe0   :  { %v385_v25 = vsel %vm384_vm7, %v383_v7, %v338_v22 }
  0xe1   :  { %v387_v31 = vsel %vm386_vm8, %v385_v25, %v352_v26 }
  0xe7   :  { %v356_v30 = vpop.xlane.xlu0 %355 }
  0xe8   :  { %v389_v33 = vsel %vm388_vm9, %v387_v31, %v356_v30 }
  0xe9   :  { %v391_v34 = vsel %vm390_vm10, %v389_v33, %v370_v29 }
  0xea   :  { %v393_v35 = vsel %vm392_vm11, %v391_v34, %v381_v32 }
  0xeb   :  { %v395_v36 = vsel %vm394_vm12, %v393_v35, 0.0 }
  0xec   :  { %397 = vst.msk [vmem:[#allocation9] sm:$0x1] %vm396_vm13, %v395_v36 }
  0xed   :  { %408 = dma.vmem_to_hbm [thread:$0]  %s404_s24, 16, %s406_s27, [#allocation10]  }
  0xee   :  { %468 = dma.done.wait [#allocation10], 16  }
  0xef   :  { %469 = vsyncadd [#allocation10], 4294967280 }
  0xf0   :  { %413 = vsyncpa [#allocation10], 1 }

</bundles_post_ra>
